<compile_context>
chip_gen: v7x
topology: tpu7x:2x2x1
jax: 0.10.0
libtpu: 0.0.40
codegen_flags: <defaults>
</compile_context>

<pallas_src>
import jax
import jax.numpy as jnp
from jax.experimental import pallas as pl
from jax.experimental.pallas import tpu as pltpu


def _self_attn_pool_kernel(x_ref, w_ref, b_ref, mask_ref, out_ref):
    # x_ref:    [TB, S, D] VMEM, native dtype (streamed; D on lanes, S on sublanes)
    # w_ref:    [1, D]     VMEM (attn_vector weight, resident across grid steps)
    # b_ref:    [1]        SMEM (attn_vector bias, scalar)
    # mask_ref: [TB, S]    VMEM float mask (1.0 = keep, 0.0 = pad; S on lanes)
    # out_ref:  [TB, D]    VMEM (sublane/lane-dense output block)
    x = x_ref[...]                                    # native dtype
    w = w_ref[...].astype(jnp.float32)                # [1, D]
    bias = b_ref[0].astype(jnp.float32)
    mask = mask_ref[...].astype(jnp.float32)          # [TB, S]

    # Attention logits: VPU multiply + lane reduce over D (f32 accumulation via
    # dtype promotion).  Avoids TB tiny [1,D]x[D,S] MXU pushes and the
    # broadcast_to(w) copies of the previous version.
    logits = jnp.sum(x * w, axis=-1) + bias           # [TB, S] f32

    # allennlp masked_softmax (multiply-then-renormalize).  The reference's
    # intermediate e/sum(e) normalization cancels against the final
    # renormalization (only the 1e-13 eps scaling differs), so it is dropped.
    v = logits * mask
    v = v - jnp.max(v, axis=-1, keepdims=True)        # numerical stability
    e = jnp.exp(v) * mask                             # masked positions -> 0
    p = e / (jnp.sum(e, axis=-1, keepdims=True) + 1e-13)   # [TB, S] f32

    # Weighted sum: broadcast multiply (VPU) + sublane reduce over S (XLU).
    # p stays f32 (no quantization of attention weights when x is low precision).
    pooled = jnp.sum(p[:, :, None] * x, axis=1)       # [TB, D] f32
    out_ref[...] = pooled.astype(out_ref.dtype)


def _pick_block_b(B, S, D, itemsize, target_bytes=4 << 20):
    """Batch rows per grid step, chosen so the streamed x tile is ~target_bytes."""
    if B <= 8:
        return B                      # block == full batch; layout constraint trivially met
    rows = max(1, int(target_bytes) // max(1, S * D * itemsize))
    bb = min(rows, B)
    bb = max(8, (bb // 8) * 8)        # multiple of 8 -> sublane-dense (block_b, D) stores
    # Keep at least 2 grid steps so ("parallel",) can use both TensorCores on v7x.
    while bb > 8 and pl.cdiv(B, bb) < 2:
        bb -= 8
    return bb


def self_attn_aggregator(x, mask, w, b, *, block_b=None):
    """x: [B,S,D], mask: [B,S] float, w: [1,D], b: [1] (or [1,1]) -> [B,D]."""
    B, S, D = x.shape
    if block_b is None:
        block_b = _pick_block_b(B, S, D, x.dtype.itemsize)
    block_b = max(1, min(block_b, B))
    grid = (pl.cdiv(B, block_b),)     # partial last block OK: rows are independent

    mask2 = mask.astype(jnp.float32)                      # [B, S], lane-dense
    w2 = jnp.asarray(w).reshape(1, D)
    b1 = jnp.asarray(b).reshape(-1)[:1].astype(jnp.float32)   # (1,) SMEM scalar

    # Explicit VMEM budget: double-buffered x/mask/out tiles + resident w + slack.
    # Capped at 48 MiB (v7x has 64 MiB physical); the floor covers v5e's 16 MiB
    # scoped default without forcing a smaller block.
    itemsize = x.dtype.itemsize
    vmem_bytes = (2 * (block_b * S * D * itemsize
                       + block_b * S * mask2.dtype.itemsize
                       + block_b * D * itemsize)
                  + 2 * D * 4 + (2 << 20))
    vmem_bytes = int(min(max(vmem_bytes, 8 << 20), 48 << 20))

    return pl.pallas_call(
        _self_attn_pool_kernel,
        out_shape=jax.ShapeDtypeStruct((B, D), x.dtype),
        grid=grid,
        in_specs=[
            pl.BlockSpec((block_b, S, D), lambda i: (i, 0, 0)),   # x (streamed)
            pl.BlockSpec((1, D), lambda i: (0, 0)),               # w (resident)
            pl.BlockSpec(memory_space=pltpu.MemorySpace.SMEM),    # bias scalar
            pl.BlockSpec((block_b, S), lambda i: (i, 0)),         # mask (streamed)
        ],
        out_specs=pl.BlockSpec((block_b, D), lambda i: (i, 0)),
        compiler_params=pltpu.CompilerParams(
            dimension_semantics=("parallel",),
            vmem_limit_bytes=vmem_bytes,
        ),
    )(x, w2, b1, mask2)


def _reference(x, mask, w, b):
    # Exact allennlp/PyTorch formula (with the intermediate normalization).
    logits = jnp.einsum("bsd,d->bs", x, jnp.asarray(w).reshape(-1)) \
        + jnp.asarray(b).reshape(-1)[0]
    v = logits * mask
    v = v - jnp.max(v, axis=-1, keepdims=True)
    e = jnp.exp(v)
    p = e / jnp.sum(e, axis=-1, keepdims=True)
    p = p * mask
    p = p / (jnp.sum(p, axis=-1, keepdims=True) + 1e-13)
    return jnp.einsum("bs,bsd->bd", p, x)


def _make_inputs(key, B, S, D, lengths):
    kx, kw, kb = jax.random.split(key, 3)
    x = jax.random.normal(kx, (B, S, D), dtype=jnp.float32)
    bound = 1.0 / (D ** 0.5)
    w = jax.random.uniform(kw, (1, D), minval=-bound, maxval=bound, dtype=jnp.float32)
    b = jax.random.uniform(kb, (1,), minval=-bound, maxval=bound, dtype=jnp.float32)
    mask = (jnp.arange(S)[None, :] < lengths[:, None]).astype(jnp.float32)
    return x, mask, w, b


if __name__ == "__main__":
    key = jax.random.PRNGKey(0)
    k1, k2 = jax.random.split(key)

    # Small demo shape consistent with the module (batch=2, seq=8, hidden=32).
    B, S, D = 2, 8, 32
    lengths = jnp.array([S, S - 3], dtype=jnp.int32)
    x, mask, w, b = _make_inputs(k1, B, S, D, lengths)

    out = self_attn_aggregator(x, mask, w, b)
    out = jax.block_until_ready(out)
    ref = _reference(x, mask, w, b)
    assert out.shape == (B, D)
    assert jnp.allclose(out, ref, atol=1e-4, rtol=1e-4), "mismatch vs reference (small)"

    # Second check: multi-step grid (block_b=8, grid=2) incl. a fully-masked row.
    B2, S2, D2 = 16, 24, 64
    lengths2 = jnp.concatenate([
        jnp.array([0], dtype=jnp.int32),                       # fully masked row -> zeros
        jax.random.randint(k2, (B2 - 1,), 1, S2 + 1, dtype=jnp.int32),
    ])
    x2, mask2, w2, b2 = _make_inputs(k2, B2, S2, D2, lengths2)

    out2 = self_attn_aggregator(x2, mask2, w2, b2)
    out2 = jax.block_until_ready(out2)
    ref2 = _reference(x2, mask2, w2, b2)
    assert out2.shape == (B2, D2)
    assert jnp.allclose(out2, ref2, atol=1e-4, rtol=1e-4), "mismatch vs reference (grid)"

    print("KERNEL_OK")
</pallas_src>

<mosaic_0001>
module attributes {stable_mosaic.version = 11 : i64} {
  func.func @_self_attn_pool_kernel(%arg0: i32, %arg1: memref<2x8x32xf32, #tpu.memory_space<vmem>>, %arg2: memref<1x32xf32, #tpu.memory_space<vmem>>, %arg3: memref<1xf32, #tpu.memory_space<smem>>, %arg4: memref<2x8xf32, #tpu.memory_space<vmem>>, %arg5: memref<2x32xf32, #tpu.memory_space<vmem>>) attributes {dimension_semantics = [#tpu.dimension_semantics<parallel>], iteration_bounds = array<i64: 1>, scalar_prefetch = 0 : i64, scratch_operands = 0 : i64, tpu.core_type = #tpu.core_type<tc>, window_params = [{transform_indices = @transform_0, window_bounds = array<i64: 2, 8, 32>}, {pipeline_mode = #tpu.pipeline_mode<synchronous>, transform_indices = @transform_1, window_bounds = array<i64: 1, 32>}, {transform_indices = @transform_2, window_bounds = array<i64: 1>}, {transform_indices = @transform_3, window_bounds = array<i64: 2, 8>}, {transform_indices = @transform_4, window_bounds = array<i64: 2, 32>}]} {
    %c0 = arith.constant 0 : index
    %c0_0 = arith.constant 0 : index
    %c0_1 = arith.constant 0 : index
    %0 = vector.load %arg1[%c0, %c0_0, %c0_1] : memref<2x8x32xf32, #tpu.memory_space<vmem>>, vector<2x8x32xf32>
    %c0_2 = arith.constant 0 : index
    %c0_3 = arith.constant 0 : index
    %1 = vector.load %arg2[%c0_2, %c0_3] : memref<1x32xf32, #tpu.memory_space<vmem>>, vector<1x32xf32>
    %c0_4 = arith.constant 0 : index
    %2 = memref.load %arg3[%c0_4] : memref<1xf32, #tpu.memory_space<smem>>
    %c0_5 = arith.constant 0 : index
    %c0_6 = arith.constant 0 : index
    %3 = vector.load %arg4[%c0_5, %c0_6] : memref<2x8xf32, #tpu.memory_space<vmem>>, vector<2x8xf32>
    %4 = vector.shape_cast %1 : vector<1x32xf32> to vector<1x1x32xf32>
    %5 = vector.broadcast %4 : vector<1x1x32xf32> to vector<2x8x32xf32>
    %6 = arith.mulf %0, %5 : vector<2x8x32xf32>
    %cst = arith.constant dense<0.000000e+00> : vector<2x8xf32>
    %7 = vector.multi_reduction <add>, %6, %cst [2] : vector<2x8x32xf32> to vector<2x8xf32>
    %8 = vector.broadcast %2 : f32 to vector<2x8xf32>
    %9 = arith.addf %7, %8 : vector<2x8xf32>
    %10 = arith.mulf %9, %3 : vector<2x8xf32>
    %cst_7 = arith.constant dense<0xFF800000> : vector<2xf32>
    %11 = vector.multi_reduction <maximumf>, %10, %cst_7 [1] : vector<2x8xf32> to vector<2xf32>
    %12 = vector.shape_cast %11 : vector<2xf32> to vector<2x1xf32>
    %13 = vector.broadcast %12 : vector<2x1xf32> to vector<2x8xf32>
    %14 = arith.subf %10, %13 : vector<2x8xf32>
    %15 = math.exp %14 : vector<2x8xf32>
    %16 = arith.mulf %15, %3 : vector<2x8xf32>
    %cst_8 = arith.constant dense<0.000000e+00> : vector<2xf32>
    %17 = vector.multi_reduction <add>, %16, %cst_8 [1] : vector<2x8xf32> to vector<2xf32>
    %18 = vector.shape_cast %17 : vector<2xf32> to vector<2x1xf32>
    %cst_9 = arith.constant 9.99999982E-14 : f32
    %19 = vector.broadcast %cst_9 : f32 to vector<2x1xf32>
    %20 = arith.addf %18, %19 : vector<2x1xf32>
    %21 = vector.broadcast %20 : vector<2x1xf32> to vector<2x8xf32>
    %22 = arith.divf %16, %21 : vector<2x8xf32>
    %23 = vector.shape_cast %22 : vector<2x8xf32> to vector<2x8x1xf32>
    %24 = vector.broadcast %23 : vector<2x8x1xf32> to vector<2x8x32xf32>
    %25 = arith.mulf %24, %0 : vector<2x8x32xf32>
    %cst_10 = arith.constant dense<0.000000e+00> : vector<2x32xf32>
    %26 = vector.multi_reduction <add>, %25, %cst_10 [1] : vector<2x8x32xf32> to vector<2x32xf32>
    %c0_11 = arith.constant 0 : index
    %c0_12 = arith.constant 0 : index
    %27 = vector.load %arg5[%c0_11, %c0_12] : memref<2x32xf32, #tpu.memory_space<vmem>>, vector<2x32xf32>
    tpu.vector_store %arg5[%c0_11, %c0_12], %26 {strides = array<i32>} : memref<2x32xf32, #tpu.memory_space<vmem>>, vector<2x32xf32>,
    return
  }
  func.func @transform_0(%arg0: i32) -> (i32, i32, i32) {
    %c0_i32 = arith.constant 0 : i32
    %c0_i32_0 = arith.constant 0 : i32
    %c0_i32_1 = arith.constant 0 : i32
    return %arg0, %c0_i32, %c0_i32_0 : i32, i32, i32
  }
  func.func @transform_1(%arg0: i32) -> (i32, i32) {
    %c0_i32 = arith.constant 0 : i32
    %c0_i32_0 = arith.constant 0 : i32
    %c0_i32_1 = arith.constant 0 : i32
    return %c0_i32, %c0_i32_0 : i32, i32
  }
  func.func @transform_2(%arg0: i32) -> i32 {
    %c0_i32 = arith.constant 0 : i32
    %c0_i32_0 = arith.constant 0 : i32
    return %c0_i32 : i32
  }
  func.func @transform_3(%arg0: i32) -> (i32, i32) {
    %c0_i32 = arith.constant 0 : i32
    %c0_i32_0 = arith.constant 0 : i32
    return %arg0, %c0_i32 : i32, i32
  }
  func.func @transform_4(%arg0: i32) -> (i32, i32) {
    %c0_i32 = arith.constant 0 : i32
    %c0_i32_0 = arith.constant 0 : i32
    return %arg0, %c0_i32 : i32, i32
  }
}

</mosaic_0001>

<bundles_post_ra>
// kernel: tpu_custom_call.1
= control target key start
LH: loop header
LB: loop body
LE: loop exit
PB: predicated region body
PF: predicated region fallthrough
CT: control target
= control target key end

     0   :  { %10 = vsyncpa [#allocation4], 0  ;;  %s357_s0 = inlined_call_operand.hbm [shape: f32[2,8,32], index: 0, kind: input, shape index: {}]   ;;  %s358_s1 = inlined_call_operand.vmem [shape: f32[1,32], index: 1, kind: input, shape index: {}]   ;;  %s359_s2 = inlined_call_operand.<no memory space> [shape: f32[1], index: 2, kind: input, shape index: {}]   ;;  %s360_s3 = inlined_call_operand.vmem [shape: f32[2,8], index: 3, kind: input, shape index: {}]   ;;  %s361_s4 = inlined_call_operand.hbm [shape: f32[2,32], index: 4, kind: output, shape index: {}]  }
   0x1   :  { %11 = vsyncpa [#allocation5], 0  ;;  %s267_s15 = smov [#allocation3]   ;;  %s219_s19 = scalar_lea.hbm %s357_s0, 256 }
   0x2   :  { %s17_s16 = sshll.u32 %s267_s15, 4  ;;  %p220_p0 = scmp.ne.s32.totalorder %s357_s0, %s219_s19  ;;  %s18_s16 = int_to_ptr.vmem [resolvable:$true] %s17_s16 }
   0x3   :  { %p223_p1 = scmp.lt.u32.totalorder %s219_s19, %s357_s0 }
   0x5   :  { %p225_p2 = pnand %p223_p1, %p220_p0 }
   0x7   :  { %228 = shalt.err (!%p225_p2)
}
   0x8   :  { %s229_s24 = scalar_lea.vmem %s18_s16, 256  ;;  %p234_p4 = scmp.lt.s32.totalorder %s18_s16, %s18_s16 }
   0x9   :  { %p230_p3 = scmp.ne.s32.totalorder %s18_s16, %s229_s24  ;;  %p235_p5 = scmp.lt.s32.totalorder %s229_s24, %s229_s24 }
   0xb   :  { %p236_p6 = por %p235_p5, %p234_p4 }
   0xd   :  { %p237_p7 = pnand %p236_p6, %p230_p3 }
   0xf   :  { %240 = shalt.err (!%p237_p7)
}
  0x10   :  { %s268_s25 = smov 128   ;;  %s269_s26 = smov 8  }
  0x11   :  { %23 = dma.hbm_to_vmem [thread:$0]  %s357_s0, 256, %s18_s16, [#allocation4], %s268_s25, %s268_s25, %s269_s26  }
  0x12   :  { %263 = dma.done.wait [#allocation4], 256  }
  0x13   :  { %264 = vsyncadd [#allocation4], 4294967040  ;;  %v57_v0 = vlaneseq  ;;  %v311_v3 = vld [vmem:[#allocation3] sm:$0xff]  ;;  %vm46_vm0 = vcmask 261120   ;;  %v316_v5 = vld [vmem:[#allocation3 + $0x8] sm:$0xff]  ;;  %v270_v14 = vmov 0   ;;  %v53_v17 = vstv %s359_s2 }
  0x14   :  { %v203_v4 = vld [vmem:[%s358_s1] ss:$0 sm:$0xff]  ;;  %209 = vset.pattern.permute.xlu0 %v270_v14  ;;  %210 = vset.pattern.permute.xlu1 %v270_v14  ;;  %vm93_vm1 = vcmask 1041409   ;;  %vm96_vm2 = vcmask 58368   ;;  %s271_s2 = smov [#allocation6]   ;;  %vm186_vm3 = vcmask 254976  }
  0x15   :  { %v58_v1 = vshrl.u32 %v57_v0, 7  ;;  %v44_v7 = vmul.f32 %v203_v4, %v311_v3  ;;  %v45_v8 = vmul.f32 %v203_v4, %v316_v5  ;;  %v37_v9 = vld [vmem:[%s360_s3] sm:$0x3]  ;;  %v84_v15 = vand.u32 127, %v57_v0  ;;  %s194_s3 = sshll.u32 %s271_s2, 4  ;;  %s195_s3 = int_to_ptr.vmem [resolvable:$true] %s194_s3 }
  0x16   :  { %s241_s7 = scalar_lea.vmem %s195_s3, 32  ;;  %p246_p9 = scmp.lt.s32.totalorder %s195_s3, %s195_s3 }
  0x17   :  { %v309_v2 = vsub.s32 0, %v58_v1  ;;  %v318_v6 = vsub.s32 1, %v58_v1  ;;  %v47_v11 = vsel %vm46_vm0, %v44_v7, 0.0  ;;  %v50_v13 = vsel %vm46_vm0, %v45_v8, 0.0  ;;  %p242_p8 = scmp.ne.s32.totalorder %s195_s3, %s241_s7  ;;  %p247_p10 = scmp.lt.s32.totalorder %s241_s7, %s241_s7 }
  0x18   :  { %48 = vadd.xlane.f32.xlu0 %v47_v11  ;;  %v87_v16 = vsub.s32 %v84_v15, %v58_v1 }
  0x19   :  { %v60_v10 = vrot.slane %v37_v9, %v309_v2  ;;  %v67_v12 = vrot.slane %v37_v9, %v318_v6  ;;  %p248_p11 = por %p247_p10, %p246_p9 }
  0x1b   :  { %62 = vbcast.lane.b32.xlu1 %v60_v10, 256  ;;  %p249_p12 = pnand %p248_p11, %p242_p8 }
  0x1c   :  { %51 = vadd.xlane.f32.xlu0 %v50_v13 }
  0x1f   :  { %69 = vbcast.lane.b32.xlu1 %v67_v12, 256 }
  0x8d   :  { %v63_v18 = vpop.permute.xlu1 %62 }
  0x91   :  { %v70_v23 = vpop.permute.xlu1 %69 }
  0xa5   :  { %v49_v19 = vpop.xlane.xlu0 %48 }
  0xa6   :  { %v54_v20 = vadd.f32 %v53_v17, %v49_v19 }
  0xa8   :  { %v73_v21 = vmul.f32 %v63_v18, %v54_v20 }
  0xa9   :  { %v52_v22 = vpop.xlane.xlu0 %51 }
  0xaa   :  { %v55_v24 = vadd.f32 %v53_v17, %v52_v22  ;;  %78 = vperm.xlu0 %209, %v73_v21  }
  0xac   :  { %v74_v25 = vmul.f32 %v70_v23, %v55_v24 }
  0xae   :  { %81 = vperm.xlu1 %210, %v74_v25  }
 0x129   :  { %v79_v26 = vpop.permute.xlu0 %78 }
 0x12a   :  { %v88_v28 = vrot.slane %v79_v26, %v87_v16 }
 0x12d   :  { %v82_v27 = vpop.permute.xlu1 %81 }
 0x12e   :  { %v92_v29 = vrot.slane %v82_v27, %v87_v16 }
 0x130   :  { %v94_v30 = vsel %vm93_vm1, %v92_v29, %v88_v28 }
 0x131   :  { %v97_v31 = vsel %vm96_vm2, %v94_v30, -inf }
 0x132   :  { %98 = vmax.xlane.f32.xlu1 %v97_v31 }
 0x1bf   :  { %v99_v32 = vpop.xlane.xlu1 %98 }
 0x1c0   :  { %v104_v33 = vrot.slane %v99_v32, %v309_v2  ;;  %v108_v34 = vrot.slane %v99_v32, %v318_v6 }
 0x1c2   :  { %v111_v35 = vsub.f32 %v73_v21, %v104_v33  ;;  %v112_v36 = vsub.f32 %v74_v25, %v108_v34 }
 0x1c4   :  { %v113_v37 = vmul.f32 1.442695, %v111_v35  ;;  %v115_v38 = vmul.f32 1.442695, %v112_v36 }
 0x1c6   :  { %211 = vpow2.f32 %v113_v37 }
 0x1c7   :  { %213 = vpow2.f32 %v115_v38 }
 0x1d0   :  { %v212_v39 = vpop.eup %211 }
 0x1d1   :  { %v214_v40 = vpop.eup %213  ;;  %v117_v41 = vmul.f32 %v212_v39, %v63_v18 }
 0x1d2   :  { %v118_v42 = vmul.f32 %v214_v40, %v70_v23 }
 0x1d3   :  { %122 = vperm.xlu1 %210, %v117_v41  }
 0x1d4   :  { %125 = vperm.xlu0 %209, %v118_v42  }
 0x252   :  { %v123_v43 = vpop.permute.xlu1 %122 }
 0x253   :  { %v126_v44 = vpop.permute.xlu0 %125  ;;  %v130_v45 = vrot.slane %v123_v43, %v87_v16 }
 0x254   :  { %v134_v46 = vrot.slane %v126_v44, %v87_v16 }
 0x256   :  { %v135_v47 = vsel %vm93_vm1, %v134_v46, %v130_v45 }
 0x257   :  { %v137_v48 = vsel %vm96_vm2, %v135_v47, 0.0 }
 0x258   :  { %138 = vadd.xlane.f32.xlu0 %v137_v48 }
 0x2e5   :  { %v139_v49 = vpop.xlane.xlu0 %138 }
 0x2e6   :  { %v140_v50 = vadd.f32 1e-13, %v139_v49 }
 0x2e8   :  { %v145_v51 = vrot.slane %v140_v50, %v309_v2  ;;  %v149_v52 = vrot.slane %v140_v50, %v318_v6 }
 0x2ea   :  { %215 = vrcp.f32 %v145_v51 }
 0x2eb   :  { %217 = vrcp.f32 %v149_v52 }
 0x2f4   :  { %v216_v53 = vpop.eup %215 }
 0x2f5   :  { %v153_v54 = vmul.f32 %v216_v53, %v117_v41  ;;  %v218_v55 = vpop.eup %217 }
 0x2f6   :  { %v155_v56 = vmul.f32 %v218_v55, %v118_v42 }
 0x2f7   :  { %158 = vperm.xlu1 %210, %v153_v54  }
 0x2fb   :  { %163 = vperm.xlu1 %210, %v155_v56  }
 0x376   :  { %v159_v57 = vpop.permute.xlu1 %158 }
 0x377   :  { %v166_v58 = vmul.f32 %v159_v57, %v311_v3 }
 0x379   :  { %v168_v59 = vsel %vm46_vm0, %v166_v58, 0.0 }
 0x37a   :  { %v169_v60 = vrot.slane %v168_v59, 4  ;;  %v164_v61 = vpop.permute.xlu1 %163 }
 0x37b   :  { %v167_v62 = vmul.f32 %v164_v61, %v316_v5 }
 0x37c   :  { %v170_v63 = vadd.f32 %v169_v60, %v168_v59 }
 0x37d   :  { %v175_v0 = vsel %vm46_vm0, %v167_v62, 0.0 }
 0x37e   :  { %v171_v1 = vrot.slane %v170_v63, 2  ;;  %v176_v2 = vrot.slane %v175_v0, 4 }
 0x380   :  { %v172_v4 = vadd.f32 %v171_v1, %v170_v63  ;;  %v177_v6 = vadd.f32 %v176_v2, %v175_v0 }
 0x382   :  { %v178_v7 = vrot.slane %v177_v6, 2  ;;  %v173_v8 = vrot.slane %v172_v4, 1 }
 0x384   :  { %v179_v9 = vadd.f32 %v178_v7, %v177_v6  ;;  %v174_v3 = vadd.f32 %v173_v8, %v172_v4 }
 0x386   :  { %v180_v10 = vrot.slane %v179_v9, 1 }
 0x388   :  { %v181_v11 = vadd.f32 %v180_v10, %v179_v9 }
 0x38a   :  { %v184_v12 = vsel %vm93_vm1, %v181_v11, %v174_v3 }
 0x38b   :  { %187 = vst.msk [vmem:[#allocation6] sm:$0x3] %vm186_vm3, %v184_v12 }
 0x38c   :  { %252 = shalt.err (!%p249_p12)
}
 0x38d   :  { %s253_s10 = scalar_lea.hbm %s361_s4, 32 }
 0x38e   :  { %p254_p13 = scmp.ne.s32.totalorder %s361_s4, %s253_s10  ;;  %p257_p0 = scmp.lt.u32.totalorder %s253_s10, %s361_s4 }
 0x390   :  { %p259_p1 = pnand %p257_p0, %p254_p13 }
 0x392   :  { %262 = shalt.err (!%p259_p1)
}
 0x393   :  { %197 = dma.vmem_to_hbm [thread:$0]  %s195_s3, 32, %s361_s4, [#allocation5]  }
 0x394   :  { %265 = dma.done.wait [#allocation5], 32  }
 0x395   :  { %266 = vsyncadd [#allocation5], 4294967264 }
 0x396   :  { %201 = vsyncpa [#allocation4], 1 }
 0x397   :  { %202 = vsyncpa [#allocation5], 1 }

</bundles_post_ra>
